<compile_context>
chip_gen: v7x
topology: tpu7x:2x2x1
jax: 0.10.0
libtpu: 0.0.40
codegen_flags: <defaults>
</compile_context>

<pallas_src>
import jax
import jax.numpy as jnp
from jax.experimental import pallas as pl
from jax.experimental.pallas import tpu as pltpu


# ----------------------------- Pallas kernel --------------------------------
def _broadcast_kernel(w_ref, out_ref):
    """Lane-dense batch broadcast of one head-permuted table.

    w_ref   : VMEM (1, 1, L)         -- permuted table row, L = n_head*attn_bn*head_dim
    out_ref : VMEM (1, bsz_tile, L)  -- bsz_tile identical copies (sublane broadcast)
    """
    out_ref[...] = jnp.broadcast_to(w_ref[...], out_ref.shape)


# ------------------------------ tiling helpers -------------------------------
def _vmem_capacity_bytes():
    """Physical VMEM of the local TPU; conservative (v7x) fallback if unknown."""
    try:
        info = pltpu.get_tpu_info()
        cap = getattr(info, "vmem_capacity_bytes", None)
        if cap:
            return int(cap)
    except Exception:
        pass
    return 64 << 20


def _sublane_for_dtype(dtype):
    """Min second-minor tile per dtype: 8 (f32), 16 (bf16), 32 (int8/fp8)."""
    return max(8, 32 // jnp.dtype(dtype).itemsize)


def _pick_bsz_tile(bsz, row_bytes, budget_bytes, sublane):
    """Batch tile whose double-buffered output block always fits the budget.

    Preference order:
      1) whole batch if it fits,
      2) largest sublane-aligned divisor of bsz within budget,
      3) largest sublane-aligned non-dividing tile within budget (partial last
         block masked by Pallas),
      4) degenerate (enormous rows): largest divisor of bsz within budget (>=1).
    Never returns a tile exceeding the budget-derived maximum.
    """
    max_tile = max(1, budget_bytes // (2 * row_bytes))
    if bsz <= max_tile:
        return bsz
    aligned_divs = [d for d in range(sublane, max_tile + 1, sublane) if bsz % d == 0]
    if aligned_divs:
        return max(aligned_divs)
    if max_tile >= sublane:
        return (max_tile // sublane) * sublane
    return max(d for d in range(1, max_tile + 1) if bsz % d == 0)


# ------------------------------ shape_prefix ---------------------------------
def shape_prefix(weights, bsz, n_head, *, out_block_budget_bytes=None):
    """weights: (n_tables, attn_bn, n_embd) -> (n_tables, bsz*n_head, attn_bn, head_dim)."""
    n_tables, attn_bn, n_embd = weights.shape
    head_dim = n_embd // n_head
    lane = attn_bn * n_embd              # lane-dense row length

    # Head permute of the small tables (layout plumbing, no batch factor):
    # (T, attn_bn, n_head, hd) -> (T, n_head, attn_bn, hd) -> (T, 1, n_head*attn_bn*hd)
    # TODO(synk): if attn_bn*head_dim % 128 == 0 this transpose could be folded into
    # the kernel via a head grid axis; negligible unless bsz/nsamples are tiny.
    perm = weights.reshape(n_tables, attn_bn, n_head, head_dim)
    perm = jnp.transpose(perm, (0, 2, 1, 3))
    perm = perm.reshape(n_tables, 1, lane)

    # Per-generation block budget: bigger blocks on 128 MiB-VMEM parts (v5e/v6e),
    # conservative 8 MiB blocks on 64 MiB-VMEM v7x.
    capacity = _vmem_capacity_bytes()
    if out_block_budget_bytes is None:
        out_block_budget_bytes = (24 << 20) if capacity >= (128 << 20) else (8 << 20)

    row_bytes = lane * perm.dtype.itemsize
    sublane = _sublane_for_dtype(perm.dtype)
    bsz_tile = _pick_bsz_tile(bsz, row_bytes, out_block_budget_bytes, sublane)
    n_b = pl.cdiv(bsz, bsz_tile)

    # v7x megacore guard: make sure the grid has >=2 blocks so both TensorCores get
    # writeback work (n_tables >= 2 in the usual wrapper; this covers n_tables == 1).
    if n_tables * n_b < 2 and bsz >= 2 * sublane:
        bsz_tile = max(sublane, ((bsz // 2) // sublane) * sublane)
        n_b = pl.cdiv(bsz, bsz_tile)

    # VMEM limit derived from the *actual* block: 2x double-buffered output block
    # + 2x input row + slack, clamped well under physical capacity.
    vmem_limit = 2 * bsz_tile * row_bytes + 2 * row_bytes + (4 << 20)
    vmem_limit = max(16 << 20, min(vmem_limit, int(capacity * 3 // 4)))

    out = pl.pallas_call(
        _broadcast_kernel,
        out_shape=jax.ShapeDtypeStruct((n_tables, bsz, lane), weights.dtype),
        grid_spec=pltpu.PrefetchScalarGridSpec(
            num_scalar_prefetch=0,
            # batch axis innermost: input block index constant across it, so the
            # table row is not re-DMA'd between batch steps.
            grid=(n_tables, n_b),
            in_specs=[pl.BlockSpec((1, 1, lane), lambda t, b: (t, 0, 0))],
            out_specs=pl.BlockSpec((1, bsz_tile, lane), lambda t, b: (t, b, 0)),
        ),
        compiler_params=pltpu.CompilerParams(
            dimension_semantics=("parallel", "parallel"),
            vmem_limit_bytes=vmem_limit,
        ),
    )(perm)

    # Free reshapes (same memory layout) to the torch-matching view.
    out = out.reshape(n_tables, bsz, n_head, attn_bn, head_dim)
    return out.reshape(n_tables, bsz * n_head, attn_bn, head_dim)


# ------------------------- pure-JAX reference (_shape) ----------------------
def _shape_ref(table, tokens, bsz, n_head):
    attn_bn, n_embd = table.shape
    head_dim = n_embd // n_head
    emb = table[tokens]                                     # (attn_bn, n_embd)
    x = jnp.broadcast_to(emb[None], (bsz, attn_bn, n_embd))
    y = x.reshape(bsz, attn_bn, n_head, head_dim)
    y = jnp.transpose(y, (0, 2, 1, 3))
    return y.reshape(bsz * n_head, attn_bn, head_dim)


# ------------------------------ module wrapper -------------------------------
def prefix_direct_init_forward(params, bsz, nsamples, attn_bn, n_head):
    """Mirrors PrefixDirectInit.forward. params: dict of 6 stacked tables,
    each (n_layer, attn_bn, n_embd)."""
    old_bsz = bsz
    bsz = bsz * nsamples
    n_layer = params["dec_self_k"].shape[0]

    # Decoder tables broadcast over bsz; encoder tables over old_bsz.
    dec_stack = jnp.concatenate(
        [params["dec_self_k"], params["dec_self_v"],
         params["dec_cross_k"], params["dec_cross_v"]], axis=0)
    enc_stack = jnp.concatenate([params["enc_k"], params["enc_v"]], axis=0)

    # TODO(synk): if downstream attention could consume a shared (un-broadcast) prefix,
    # skipping the materialized batch fold-out would cut HBM write traffic by bsz x.
    dec_shaped = shape_prefix(dec_stack, bsz, n_head)       # (4L, bsz*H, bn, hd)
    enc_shaped = shape_prefix(enc_stack, old_bsz, n_head)   # (2L, old_bsz*H, bn, hd)

    # Padding masks built once and reused across layers (torch.zeros -> float32).
    dec_mask = jnp.zeros((bsz, attn_bn), jnp.float32)
    enc_mask = jnp.zeros((old_bsz, attn_bn), jnp.float32)

    result = []
    for i in range(n_layer):
        temp = {
            "self": {
                "prev_key": dec_shaped[0 * n_layer + i],
                "prev_value": dec_shaped[1 * n_layer + i],
                "prev_key_padding_mask": dec_mask,
            },
            "encoder_decoder": {
                "prev_key": dec_shaped[2 * n_layer + i],
                "prev_value": dec_shaped[3 * n_layer + i],
                "prev_key_padding_mask": dec_mask,
            },
            "encoder": {
                "prev_key": enc_shaped[0 * n_layer + i],
                "prev_value": enc_shaped[1 * n_layer + i],
                "prev_key_padding_mask": enc_mask,
            },
        }
        result.append(temp)
    return result


# ----------------------------------- main ------------------------------------
if __name__ == "__main__":
    # Small, config-consistent shapes.
    n_layer = 2          # config.num_hidden_layers
    n_head = 4           # config.decoder_attention_heads
    n_embd = 32          # config.d_model
    attn_bn = 8          # args.attn_bn (prefix length)
    head_dim = n_embd // n_head
    bsz, nsamples = 2, 1

    # Deterministic init: nn.Embedding weights ~ N(0, 0.02) (init_bert_weights).
    key = jax.random.PRNGKey(0)
    names = ["enc_k", "enc_v", "dec_self_k", "dec_self_v", "dec_cross_k", "dec_cross_v"]
    keys = jax.random.split(key, len(names))
    params = {
        name: 0.02 * jax.random.normal(k, (n_layer, attn_bn, n_embd), jnp.float32)
        for name, k in zip(names, keys)
    }

    result = prefix_direct_init_forward(params, bsz, nsamples, attn_bn, n_head)
    jax.block_until_ready(result)

    # Verify against a pure-JAX reference of the torch forward.
    tokens = jnp.arange(attn_bn, dtype=jnp.int32)
    total_bsz = bsz * nsamples
    for i in range(n_layer):
        checks = [
            (result[i]["self"]["prev_key"], params["dec_self_k"][i], total_bsz),
            (result[i]["self"]["prev_value"], params["dec_self_v"][i], total_bsz),
            (result[i]["encoder_decoder"]["prev_key"], params["dec_cross_k"][i], total_bsz),
            (result[i]["encoder_decoder"]["prev_value"], params["dec_cross_v"][i], total_bsz),
            (result[i]["encoder"]["prev_key"], params["enc_k"][i], bsz),
            (result[i]["encoder"]["prev_value"], params["enc_v"][i], bsz),
        ]
        for got, table, b in checks:
            want = _shape_ref(table, tokens, b, n_head)
            assert got.shape == want.shape, (got.shape, want.shape)
            assert jnp.allclose(got, want, atol=1e-6), "mismatch vs reference"
        assert result[i]["self"]["prev_key_padding_mask"].shape == (total_bsz, attn_bn)
        assert result[i]["encoder"]["prev_key_padding_mask"].shape == (bsz, attn_bn)

    print("KERNEL_OK")
</pallas_src>

<mosaic_0001>
module attributes {stable_mosaic.version = 11 : i64} {
  func.func @_broadcast_kernel(%arg0: i32, %arg1: i32, %arg2: memref<1x1x256xf32, #tpu.memory_space<vmem>>, %arg3: memref<1x2x256xf32, #tpu.memory_space<vmem>>) attributes {dimension_semantics = [#tpu.dimension_semantics<parallel>, #tpu.dimension_semantics<parallel>], iteration_bounds = array<i64: 8, 1>, scalar_prefetch = 0 : i64, scratch_operands = 0 : i64, tpu.core_type = #tpu.core_type<tc>, window_params = [{transform_indices = @transform_0, window_bounds = array<i64: 1, 1, 256>}, {transform_indices = @transform_1, window_bounds = array<i64: 1, 2, 256>}]} {
    %c0 = arith.constant 0 : index
    %c0_0 = arith.constant 0 : index
    %c0_1 = arith.constant 0 : index
    %0 = vector.load %arg2[%c0, %c0_0, %c0_1] : memref<1x1x256xf32, #tpu.memory_space<vmem>>, vector<1x1x256xf32>
    %1 = vector.shape_cast %0 : vector<1x1x256xf32> to vector<1x1x256xf32>
    %2 = vector.broadcast %1 : vector<1x1x256xf32> to vector<1x2x256xf32>
    %c0_2 = arith.constant 0 : index
    %c0_3 = arith.constant 0 : index
    %c0_4 = arith.constant 0 : index
    %3 = vector.load %arg3[%c0_2, %c0_3, %c0_4] : memref<1x2x256xf32, #tpu.memory_space<vmem>>, vector<1x2x256xf32>
    tpu.vector_store %arg3[%c0_2, %c0_3, %c0_4], %2 {strides = array<i32>} : memref<1x2x256xf32, #tpu.memory_space<vmem>>, vector<1x2x256xf32>,
    return
  }
  func.func @transform_0(%arg0: i32, %arg1: i32) -> (i32, i32, i32) {
    %c0_i32 = arith.constant 0 : i32
    %c0_i32_0 = arith.constant 0 : i32
    %c0_i32_1 = arith.constant 0 : i32
    return %arg0, %c0_i32, %c0_i32_0 : i32, i32, i32
  }
  func.func @transform_1(%arg0: i32, %arg1: i32) -> (i32, i32, i32) {
    %c0_i32 = arith.constant 0 : i32
    %c0_i32_0 = arith.constant 0 : i32
    return %arg0, %arg1, %c0_i32 : i32, i32, i32
  }
}

</mosaic_0001>

<bundles_post_ra>
// kernel: tpu_custom_call.1
= control target key start
LH: loop header
LB: loop body
LE: loop exit
PB: predicated region body
PF: predicated region fallthrough
CT: control target
= control target key end

     0   :  { %6 = vsyncpa [#allocation3], 0  ;;  %s642_s0 = inlined_call_operand.hbm [shape: f32[8,1,256], index: 0, kind: input, shape index: {}]   ;;  %s643_s1 = inlined_call_operand.hbm [shape: f32[8,2,256], index: 1, kind: output, shape index: {}]  }
   0x1   :  { %8 = vsyncpa [#allocation3 + $0x1], 0 }
   0x2   :  { %9 = vsyncpa [#allocation4], 0 }
   0x3   :  { %11 = vsyncpa [#allocation4 + $0x1], 0  ;;  %s471_s6 = smov 0   ;;  %s473_s7 = smov 0  }
   0x4   :  { %s475_s8 = smov 0   ;;  %s477_s9 = smov 0  }
   0x5   :  { %s479_s10 = smov 0   ;;  %s481_s11 = smov 0  }
   0x6 LB: > { %s265_s12 = sadd.s32 4294967295, %s457_s11   ;;  %s266_s13 = sadd.s32 4294967294, %s457_s11   ;;  %s457_s11 = sphi %s481_s11, %s17_s11   ;;  %s453_s10 = sphi %s479_s10, %s658_s10   ;;  %s449_s9 = sphi %s477_s9, %s657_s9   ;;  %s445_s8 = sphi %s475_s8, %s656_s8   ;;  %s441_s7 = sphi %s473_s7, %s655_s7   ;;  %s437_s6 = sphi %s471_s6, %s654_s6  }
   0x7   : > { %s29_s14 = sadd.s32 1, %s453_s10  ;;  %s36_s15 = sadd.s32 1, %s445_s8 }
   0x8   : > { %p31_p0 = scmp.ge.s32.totalorder %s29_s14, 8  ;;  %p43_p1 = scmp.ne.s32.totalorder %s445_s8, %s441_s7 }
   0x9   : > { %p44_p2 = scmp.eq.s32.totalorder %s457_s11, 0  ;;  %p49_p3 = scmp.ne.s32.totalorder %s441_s7, %s437_s6 }
   0xa   : > { %s660_s14 = smov (%p31_p0, %s29_s14), 0  ;;  %p50_p5 = scmp.eq.s32.totalorder %s265_s12, 0 }
   0xb   : > { %p512_p4 = por %p44_p2, %p43_p1  ;;  %s33_s17 = ssub.s32 %s453_s10, %s660_s14 }
   0xc   : > { %p75_p6 = scmp.eq.s32.totalorder %s265_s12, 7  ;;  %p34_p7 = scmp.eq.s32.totalorder %s33_s17, 0 }
   0xd   : > { %p518_p8 = por %p50_p5, %p49_p3  ;;  %p81_p10 = scmp.eq.s32.totalorder %s266_s13, 7 }
   0xe   : > { %p522_p9 = por %p75_p6, %p43_p1  ;;  %p295_p12 = scmp.lt.s32.totalorder %s457_s11, 8 }
   0xf   : > { %s527_s20 = scalar_select %p34_p7, %s445_s8, %s36_s15  }
  0x10   : > { %s647_s19 = scalar_select %p522_p9, 1, 0 }
  0x11   : > { %p529_p11 = por %p81_p10, %p49_p3  ;;  %s101_s22 = sand.u32 1, %s445_s8  }
  0x12   : > { %s269_s23 = sshll.u32 %s101_s22, 1  ;;  %s281_s24 = sshll.u32 %s453_s10, 5 }
  0x13   : > { %s648_s21 = scalar_select %p529_p11, 1, 0 }
  0x14   : > { %s539_s27 = scalar_lea.hbm %s642_s0, %s281_s24  ;;  %s105_s28 = scalar_lea.vmem [#allocation2], %s269_s23 }
  0x15   : > { %s113_s29 = sshll.u32 %s105_s28, 4  ;;  %p545_p13 = pnand %p295_p12, %p512_p4  ;;  %s541_s29 = int_to_ptr.vmem [resolvable:$true] %s113_s29 }
  0x16   : > { %s102_s2 = scalar_lea.sflag [#allocation3], %s101_s22  ;;  %s345_s3 = scalar_lea.hbm %s539_s27, 32 }
  0x17   : > { %p346_p2 = scmp.ne.s32.totalorder %s539_s27, %s345_s3  ;;  %p347_p3 = pneg %p545_p13 }
  0x18   : > { %s350_s12 = scalar_lea.hbm %s642_s0, 256  ;;  %p351_p4 = scmp.lt.u32.totalorder %s539_s27, %s642_s0 }
  0x19   : > { %p348_p5 = pnand %p347_p3, %p346_p2  ;;  %p352_p7 = scmp.lt.u32.totalorder %s350_s12, %s345_s3 }
  0x1a   : > { %p354_p12 = scmp.lt.u32.totalorder %s345_s3, %s539_s27 }
  0x1b   : > { %p349_p6 = pneg %p348_p5  ;;  %p353_p10 = por %p352_p7, %p351_p4 }
  0x1d   : > { %p355_p0 = por %p354_p12, %p353_p10 }
  0x1f   : > { %p356_p1 = pnand %p355_p0, %p349_p6 }
  0x21   : > { %359 = shalt.err (!%p356_p1)
}
  0x22   : > { %s360_s16 = scalar_lea.vmem %s541_s29, 32  ;;  %s459_s17 = smov [#allocation2]  }
  0x23   : > { %p361_p2 = scmp.ne.s32.totalorder %s541_s29, %s360_s16  ;;  %s365_s22 = sshll.u32 %s459_s17, 4  ;;  %s366_s22 = int_to_ptr.vmem [resolvable:$false] %s365_s22 }
  0x24   : > { %s367_s23 = scalar_lea.vmem %s366_s22, 64  ;;  %p368_p9 = scmp.lt.s32.totalorder %s541_s29, %s366_s22 }
  0x25   : > { %p363_p5 = pnand %p361_p2, %p347_p3  ;;  %p369_p4 = scmp.lt.s32.totalorder %s367_s23, %s360_s16 }
  0x27   : > { %p364_p11 = pneg %p363_p5  ;;  %p370_p7 = por %p369_p4, %p368_p9 }
  0x29   : > { %p371_p10 = pnand %p370_p7, %p364_p11 }
  0x2b   : > { %374 = shalt.err (!%p371_p10)
}
  0x2c   : > { %290 = dma.hbm_to_vmem [thread:$0]  (!%p545_p13), %s539_s27, 32, %s541_s29, %s102_s2  }
  0x2d   : > { %p650_p0 = scmp.lt.s32.totalorder %s457_s11, 9  ;;  %p651_p1 = scmp.ge.s32.totalorder %s457_s11, 1 }
  0x2f   : > { %p119_p3 = pnand %p651_p1, %p650_p0 }
  0x30   : > { %s581_s24 = sand.u32 (!%p119_p3), 1, %s441_s7  }
  0x31   : > { %122 = sbr.rel (%p119_p3) target bundleno = 83 (0x53), region = 24  ;;  %s273_s25 = sshll.u32 (!%p119_p3), %s581_s24, 1 }
  0x32   : > { %s125_s26 = scalar_lea.sflag (!%p119_p3), [#allocation3], %s581_s24  ;;  %s128_s28 = scalar_lea.vmem (!%p119_p3), [#allocation2], %s273_s25 }
  0x38   : > { %428 = dma.done.wait (%p518_p8), %s125_s26, 32  }
  0x39   : > { %430 = vsyncadd (%p518_p8), %s125_s26, 4294967264  ;;  %v149_v0 = vlaneseq  ;;  %s274_s27 = sshll.u32 %s581_s24, 2  ;;  %v147_v4 = vld [vmem:[%s128_s28] sm:$0x3]  ;;  %s282_s2 = sshll.u32 %s449_s9, 6 }
  0x3a   : > { %s146_s29 = scalar_lea.vmem [#allocation5], %s274_s27  ;;  %s596_s4 = scalar_lea.hbm %s643_s1, %s282_s2 }
  0x3b   : > { %v150_v1 = vshrl.u32 %v149_v0, 7  ;;  %s184_s30 = sshll.u32 %s146_s29, 4  ;;  %s168_s5 = scalar_lea.sflag [#allocation4], %s581_s24  ;;  %s591_s30 = int_to_ptr.vmem [resolvable:$true] %s184_s30 }
  0x3c   : > { %s375_s12 = scalar_lea.vmem %s591_s30, 64  ;;  %p652_p9 = scmp.ne.s32.totalorder %s647_s19, 0 }
  0x3d   : > { %v151_v2 = vsub.s32 0, %v150_v1  ;;  %v155_v3 = vsub.s32 1, %v150_v1  ;;  %p376_p8 = scmp.ne.s32.totalorder %s591_s30, %s375_s12  ;;  %s460_s9 = smov [#allocation5]  }
  0x3e   : > { %s379_s13 = sshll.u32 %s460_s9, 4  ;;  %s380_s13 = int_to_ptr.vmem [resolvable:$false] %s379_s13 }
  0x3f   : > { %v152_v5 = vrot.slane %v147_v4, %v151_v2  ;;  %v156_v6 = vrot.slane %v147_v4, %v155_v3  ;;  %p377_p11 = pnand %p376_p8, %p652_p9  ;;  %s381_s15 = scalar_lea.vmem %s380_s13, 128 }
  0x40   : > { %p382_p6 = scmp.lt.s32.totalorder %s591_s30, %s380_s13  ;;  %p383_p12 = scmp.lt.s32.totalorder %s381_s15, %s375_s12 }
  0x41   : > { %v157_v7 = vcombine.low %v152_v5, %v156_v6  ;;  %p378_p13 = pneg %p377_p11 }
  0x42   : > { %p384_p2 = por %p383_p12, %p382_p6 }
  0x43   : > { %275 = vst.sshfl [vmem:[%s146_s29] sm:$0x33 pattern:$0x76325410] %v157_v7 }
  0x44   : > { %p385_p5 = pnand %p384_p2, %p378_p13 }
  0x46   : > { %388 = shalt.err (!%p385_p5)
}
  0x47   : > { %s389_s16 = scalar_lea.hbm %s596_s4, 64  ;;  %s393_s23 = scalar_lea.hbm %s643_s1, 512 }
  0x48   : > { %p390_p4 = scmp.ne.s32.totalorder %s596_s4, %s389_s16  ;;  %p394_p0 = scmp.lt.u32.totalorder %s596_s4, %s643_s1 }
  0x49   : > { %p395_p1 = scmp.lt.u32.totalorder %s393_s23, %s389_s16  ;;  %p397_p8 = scmp.lt.u32.totalorder %s389_s16, %s596_s4 }
  0x4a   : > { %p391_p7 = pnand %p390_p4, %p652_p9 }
  0x4b   : > { %p396_p3 = por %p395_p1, %p394_p0 }
  0x4c   : > { %p392_p10 = pneg %p391_p7 }
  0x4d   : > { %p398_p11 = por %p397_p8, %p396_p3 }
  0x4f   : > { %p399_p13 = pnand %p398_p11, %p392_p10 }
  0x51   : > { %402 = shalt.err (!%p399_p13)
}
  0x52   : > { %285 = dma.vmem_to_hbm [thread:$0]  (%p652_p9), %s591_s30, 64, %s596_s4, %s168_s5  }
  0x53 PF: > { %p296_p6 = scmp.ge.s32.totalorder %s457_s11, 2  ;;  %s196_s26 = sand.u32 1, %s437_s6  }
  0x54   : > { %p653_p12 = scmp.ne.s32.totalorder %s648_s21, 0  ;;  %s197_s28 = scalar_lea.sflag [#allocation4], %s196_s26 }
  0x56   : > { %p292_p2 = pnand %p296_p6, %p653_p12 }
  0x58   : > { %432 = dma.done.wait (!%p292_p2), %s197_s28, 64  }
  0x59   : > { %434 = vsyncadd (!%p292_p2), %s197_s28, 4294967232  ;;  %s17_s11 = sadd.s32 1, %s457_s11   ;;  %s654_s6 = smov %s441_s7 }
  0x5a   : > { %p14_p5 = scmp.ge.s32.totalorder %s17_s11, 10   ;;  %s655_s7 = smov %s445_s8 }
  0x5b   : > { %s656_s8 = smov %s527_s20  ;;  %s657_s9 = smov %s453_s10 }
  0x5c   : > { %s658_s10 = smov %s660_s14  ;;  %16 = sbr.rel (!%p14_p5) target bundleno = 6 (0x6), region = 69 }
  0x63   :  { %202 = vsyncpa [#allocation3], 1 }
  0x64   :  { %204 = vsyncpa [#allocation3 + $0x1], 1 }
  0x65   :  { %205 = vsyncpa [#allocation4], 1 }
  0x66   :  { %207 = vsyncpa [#allocation4 + $0x1], 1 }

</bundles_post_ra>
